<compile_context>
chip_gen: v6e
topology: v6e:2x2x1
jax: 0.10.0
libtpu: 0.0.40
codegen_flags: <defaults>
</compile_context>

<pallas_src>
import jax
import jax.numpy as jnp
from jax import lax
from jax.experimental import pallas as pl
from jax.experimental.pallas import tpu as pltpu


def _round_up(x, m):
    return (x + m - 1) // m * m


def custom_clip_kernel(alpha_ref, scale_ref,          # SMEM (1,1) scalars
                       img_ref, wvis_ref,             # [tm,tk] bf16, [tk,Dp] bf16
                       base_ref, res_ref,             # [Cp,Dp] f32, [Cp,Dp] f32
                       out_ref,                       # [tm,Cp] f32
                       acc_ref):                      # VMEM [tm,Dp] f32 scratch
    k = pl.program_id(1)

    @pl.when(k == 0)
    def _():
        acc_ref[...] = jnp.zeros_like(acc_ref)

    # ---- image encoder (synthetic linear projection): bf16 MXU, f32 accum ----
    acc_ref[...] += jnp.dot(img_ref[...], wvis_ref[...],
                            preferred_element_type=jnp.float32)

    # ---- epilogue: only on the last reduction step ----
    @pl.when(k == pl.num_programs(1) - 1)
    def _():
        alpha = alpha_ref[0, 0]
        scale = jnp.exp(scale_ref[0, 0])

        # image features: L2 normalize (rsqrt -> EUP slot).  Epsilon floor only
        # protects all-zero padded batch rows (real rows have O(1) norms).
        img_feat = acc_ref[...]                                        # [tm, Dp] f32
        img_sq = jnp.sum(img_feat * img_feat, axis=-1, keepdims=True)
        img_n = img_feat * lax.rsqrt(jnp.maximum(img_sq, 1e-30))

        # TaskResLearner: base + alpha * residual, then L2 normalize.
        txt = base_ref[...] + alpha * res_ref[...]                     # [Cp, Dp] f32
        txt_sq = jnp.sum(txt * txt, axis=-1, keepdims=True)
        txt_n = txt * lax.rsqrt(jnp.maximum(txt_sq, 1e-30))

        # logits = exp(logit_scale) * img_n @ txt_n.T   (contract last dims of
        # both operands -> no in-kernel transpose).
        logits = lax.dot_general(
            img_n, txt_n,
            dimension_numbers=(((1,), (1,)), ((), ())),
            preferred_element_type=jnp.float32)                        # [tm, Cp]
        out_ref[...] = (scale * logits).astype(out_ref.dtype)


def custom_clip_forward(image_nchw, w_vis, base_text_features, text_residuals,
                        alpha, logit_scale, *, tm=None, tk=None):
    """image_nchw: [B,C,H,W]; w_vis: [C*H*W, D]; base/residuals: [n_cls, D]."""
    B = image_nchw.shape[0]
    P = image_nchw.shape[1] * image_nchw.shape[2] * image_nchw.shape[3]
    n_cls, D = base_text_features.shape

    # Tile sizes (bf16-friendly: sublane multiple of 16, lane multiple of 128).
    # Pick the biggest reduction tile that comfortably fits VMEM double-buffers.
    if tm is None:
        tm = min(256, _round_up(B, 16))
    if tk is None:
        tk = min(1024, _round_up(P, 128))

    B_pad = _round_up(B, tm)
    P_pad = _round_up(P, tk)
    D_pad = _round_up(D, 128)       # lane-dense feature dim (zero-pad: norms/dots unchanged)
    C_pad = _round_up(n_cls, 128)   # lane-dense class dim for an unmasked output store

    # Glue: flatten NCHW -> [B, P] (row-major, same as torch .reshape); keep
    # bf16 for the MXU (no wrapper-side f32 cast -> half the HBM traffic).
    img = image_nchw.reshape(B, P).astype(jnp.bfloat16)
    img = jnp.pad(img, ((0, B_pad - B), (0, P_pad - P)))
    wv = jnp.pad(w_vis.astype(jnp.bfloat16), ((0, P_pad - P), (0, D_pad - D)))

    base = jnp.pad(base_text_features.astype(jnp.float32),
                   ((0, C_pad - n_cls), (0, D_pad - D)))
    if C_pad > n_cls:
        # give padded class rows unit norm so the epilogue rsqrt stays finite
        base = base.at[n_cls:, 0].set(1.0)
    res = jnp.pad(text_residuals.astype(jnp.float32),
                  ((0, C_pad - n_cls), (0, D_pad - D)))

    alpha_arr = jnp.full((1, 1), alpha, dtype=jnp.float32)
    scale_arr = jnp.full((1, 1), logit_scale, dtype=jnp.float32)

    grid = (B_pad // tm, P_pad // tk)
    smem = pltpu.MemorySpace.SMEM

    cost = pl.CostEstimate(
        flops=2 * B_pad * P_pad * D_pad + 2 * B_pad * D_pad * C_pad,
        transcendentals=B_pad + C_pad + 1,
        bytes_accessed=(img.size * 2 + wv.size * 2 + base.size * 4
                        + res.size * 4 + B_pad * C_pad * 4),
    )

    out = pl.pallas_call(
        custom_clip_kernel,
        out_shape=jax.ShapeDtypeStruct((B_pad, C_pad), jnp.float32),
        grid_spec=pltpu.PrefetchScalarGridSpec(
            num_scalar_prefetch=0,
            grid=grid,
            in_specs=[
                pl.BlockSpec((1, 1), lambda m, k: (0, 0), memory_space=smem),
                pl.BlockSpec((1, 1), lambda m, k: (0, 0), memory_space=smem),
                pl.BlockSpec((tm, tk), lambda m, k: (m, k)),        # image tile
                pl.BlockSpec((tk, D_pad), lambda m, k: (k, 0)),     # w_vis tile
                pl.BlockSpec((C_pad, D_pad), lambda m, k: (0, 0)),  # base (grid-invariant)
                pl.BlockSpec((C_pad, D_pad), lambda m, k: (0, 0)),  # residuals
            ],
            out_specs=pl.BlockSpec((tm, C_pad), lambda m, k: (m, 0)),
            scratch_shapes=[pltpu.VMEM((tm, D_pad), jnp.float32)],
        ),
        compiler_params=pltpu.CompilerParams(
            dimension_semantics=("parallel", "arbitrary")),
        cost_estimate=cost,
    )(alpha_arr, scale_arr, img, wv, base, res)

    return out[:B, :n_cls]


def _reference(image_nchw, w_vis, base, res, alpha, logit_scale):
    """Reference mirroring the kernel's bf16 MXU operand precision (f32 accum)."""
    B = image_nchw.shape[0]
    img = image_nchw.reshape(B, -1).astype(jnp.bfloat16).astype(jnp.float32)
    wv = w_vis.astype(jnp.bfloat16).astype(jnp.float32)
    feats = img @ wv
    txt = base.astype(jnp.float32) + alpha * res.astype(jnp.float32)
    feats = feats / jnp.linalg.norm(feats, axis=-1, keepdims=True)
    txt = txt / jnp.linalg.norm(txt, axis=-1, keepdims=True)
    return jnp.exp(jnp.float32(logit_scale)) * feats @ txt.T


if __name__ == "__main__":
    key = jax.random.PRNGKey(0)
    k_img, k_w, k_base, k_res = jax.random.split(key, 4)

    # Small shapes: batch=2, channels=4, spatial=16x16, embed dim=32, 8 classes.
    B, C, H, W = 2, 4, 16, 16
    D = 32
    n_cls = 8
    P = C * H * W

    image = jax.random.normal(k_img, (B, C, H, W), dtype=jnp.float32)
    w_vis = jax.random.normal(k_w, (P, D), dtype=jnp.float32) * 0.02
    base_text_features = jax.random.normal(k_base, (n_cls, D), dtype=jnp.float32)
    # nn.Parameter initialized to zeros in TaskResLearner; use small nonzero
    # deterministic residuals so the alpha-scaled path is exercised.
    text_residuals = jax.random.normal(k_res, (n_cls, D), dtype=jnp.float32) * 0.1

    alpha = 0.5                                      # cfg.TRAINER.TaskRes.RESIDUAL_SCALE
    logit_scale = float(jnp.log(jnp.float32(1.0 / 0.07)))  # CLIP's standard init

    logits = custom_clip_forward(image, w_vis, base_text_features,
                                 text_residuals, alpha, logit_scale)
    logits = jax.block_until_ready(logits)

    ref = _reference(image, w_vis, base_text_features, text_residuals,
                     alpha, logit_scale)
    assert logits.shape == (B, n_cls)
    assert jnp.allclose(logits, ref, atol=1e-2, rtol=1e-2), (logits, ref)

    print("KERNEL_OK")
</pallas_src>

<mosaic_0001>
module attributes {stable_mosaic.version = 11 : i64} {
  func.func @custom_clip_kernel(%arg0: i32, %arg1: i32, %arg2: memref<1x1xf32, #tpu.memory_space<smem>>, %arg3: memref<1x1xf32, #tpu.memory_space<smem>>, %arg4: memref<16x1024xbf16, #tpu.memory_space<vmem>>, %arg5: memref<1024x128xbf16, #tpu.memory_space<vmem>>, %arg6: memref<128x128xf32, #tpu.memory_space<vmem>>, %arg7: memref<128x128xf32, #tpu.memory_space<vmem>>, %arg8: memref<16x128xf32, #tpu.memory_space<vmem>>, %arg9: memref<16x128xf32, #tpu.memory_space<vmem>>) attributes {dimension_semantics = [#tpu.dimension_semantics<parallel>, #tpu.dimension_semantics<arbitrary>], iteration_bounds = array<i64: 1, 1>, scalar_prefetch = 0 : i64, scratch_operands = 1 : i64, tpu.core_type = #tpu.core_type<tc>, window_params = [{transform_indices = @transform_0, window_bounds = array<i64: 1, 1>}, {transform_indices = @transform_1, window_bounds = array<i64: 1, 1>}, {transform_indices = @transform_2, window_bounds = array<i64: 16, 1024>}, {transform_indices = @transform_3, window_bounds = array<i64: 1024, 128>}, {pipeline_mode = #tpu.pipeline_mode<synchronous>, transform_indices = @transform_4, window_bounds = array<i64: 128, 128>}, {pipeline_mode = #tpu.pipeline_mode<synchronous>, transform_indices = @transform_5, window_bounds = array<i64: 128, 128>}, {transform_indices = @transform_6, window_bounds = array<i64: 16, 128>}]} {
    %c0_i32 = arith.constant 0 : i32
    %0 = arith.cmpi eq, %arg1, %c0_i32 : i32
    %1 = arith.extui %0 : i1 to i32
    %c0_i32_0 = arith.constant 0 : i32
    %2 = arith.cmpi ne, %1, %c0_i32_0 : i32
    scf.if %2 {
      %cst_10 = arith.constant 0.000000e+00 : f32
      %12 = vector.broadcast %cst_10 : f32 to vector<16x128xf32>
      %c0_11 = arith.constant 0 : index
      %c0_12 = arith.constant 0 : index
      %13 = vector.load %arg9[%c0_11, %c0_12] : memref<16x128xf32, #tpu.memory_space<vmem>>, vector<16x128xf32>
      tpu.vector_store %arg9[%c0_11, %c0_12], %12 {strides = array<i32>} : memref<16x128xf32, #tpu.memory_space<vmem>>, vector<16x128xf32>,
    } else {
    }
    %c0 = arith.constant 0 : index
    %c0_1 = arith.constant 0 : index
    %3 = vector.load %arg9[%c0, %c0_1] : memref<16x128xf32, #tpu.memory_space<vmem>>, vector<16x128xf32>
    %c0_2 = arith.constant 0 : index
    %c0_3 = arith.constant 0 : index
    %4 = vector.load %arg4[%c0_2, %c0_3] : memref<16x1024xbf16, #tpu.memory_space<vmem>>, vector<16x1024xbf16>
    %c0_4 = arith.constant 0 : index
    %c0_5 = arith.constant 0 : index
    %5 = vector.load %arg5[%c0_4, %c0_5] : memref<1024x128xbf16, #tpu.memory_space<vmem>>, vector<1024x128xbf16>
    %cst = arith.constant dense<0.000000e+00> : vector<16x128xf32>
    %6 = tpu.matmul %4, %5, %cst {dimension_numbers = #tpu.dot_dimension_numbers<[1], [0], [0], [1], [0, 0, 1, 1], [], []>} : vector<16x1024xbf16>, vector<1024x128xbf16>, vector<16x128xf32> -> vector<16x128xf32>
    %7 = arith.addf %3, %6 : vector<16x128xf32>
    %c0_6 = arith.constant 0 : index
    %c0_7 = arith.constant 0 : index
    %8 = vector.load %arg9[%c0_6, %c0_7] : memref<16x128xf32, #tpu.memory_space<vmem>>, vector<16x128xf32>
    tpu.vector_store %arg9[%c0_6, %c0_7], %7 {strides = array<i32>} : memref<16x128xf32, #tpu.memory_space<vmem>>, vector<16x128xf32>,
    %c0_i32_8 = arith.constant 0 : i32
    %9 = arith.cmpi eq, %arg1, %c0_i32_8 : i32
    %10 = arith.extui %9 : i1 to i32
    %c0_i32_9 = arith.constant 0 : i32
    %11 = arith.cmpi ne, %10, %c0_i32_9 : i32
    scf.if %11 {
      %c0_10 = arith.constant 0 : index
      %c0_11 = arith.constant 0 : index
      %12 = memref.load %arg2[%c0_10, %c0_11] : memref<1x1xf32, #tpu.memory_space<smem>>
      %c0_12 = arith.constant 0 : index
      %c0_13 = arith.constant 0 : index
      %13 = memref.load %arg3[%c0_12, %c0_13] : memref<1x1xf32, #tpu.memory_space<smem>>
      %14 = math.exp %13 : f32
      %c0_14 = arith.constant 0 : index
      %c0_15 = arith.constant 0 : index
      %15 = vector.load %arg9[%c0_14, %c0_15] : memref<16x128xf32, #tpu.memory_space<vmem>>, vector<16x128xf32>
      %16 = arith.mulf %15, %15 : vector<16x128xf32>
      %cst_16 = arith.constant dense<0.000000e+00> : vector<16xf32>
      %17 = vector.multi_reduction <add>, %16, %cst_16 [1] : vector<16x128xf32> to vector<16xf32>
      %18 = vector.shape_cast %17 : vector<16xf32> to vector<16x1xf32>
      %cst_17 = arith.constant 1.000000e-30 : f32
      %19 = vector.broadcast %cst_17 : f32 to vector<16x1xf32>
      %20 = arith.maximumf %18, %19 : vector<16x1xf32>
      %21 = math.rsqrt %20 : vector<16x1xf32>
      %22 = vector.broadcast %21 : vector<16x1xf32> to vector<16x128xf32>
      %23 = arith.mulf %15, %22 : vector<16x128xf32>
      %c0_18 = arith.constant 0 : index
      %c0_19 = arith.constant 0 : index
      %24 = vector.load %arg6[%c0_18, %c0_19] : memref<128x128xf32, #tpu.memory_space<vmem>>, vector<128x128xf32>
      %c0_20 = arith.constant 0 : index
      %c0_21 = arith.constant 0 : index
      %25 = vector.load %arg7[%c0_20, %c0_21] : memref<128x128xf32, #tpu.memory_space<vmem>>, vector<128x128xf32>
      %26 = vector.broadcast %12 : f32 to vector<128x128xf32>
      %27 = arith.mulf %26, %25 : vector<128x128xf32>
      %28 = arith.addf %24, %27 : vector<128x128xf32>
      %29 = arith.mulf %28, %28 : vector<128x128xf32>
      %cst_22 = arith.constant dense<0.000000e+00> : vector<128xf32>
      %30 = vector.multi_reduction <add>, %29, %cst_22 [1] : vector<128x128xf32> to vector<128xf32>
      %31 = vector.shape_cast %30 : vector<128xf32> to vector<128x1xf32>
      %cst_23 = arith.constant 1.000000e-30 : f32
      %32 = vector.broadcast %cst_23 : f32 to vector<128x1xf32>
      %33 = arith.maximumf %31, %32 : vector<128x1xf32>
      %34 = math.rsqrt %33 : vector<128x1xf32>
      %35 = vector.broadcast %34 : vector<128x1xf32> to vector<128x128xf32>
      %36 = arith.mulf %28, %35 : vector<128x128xf32>
      %cst_24 = arith.constant dense<0.000000e+00> : vector<16x128xf32>
      %37 = tpu.matmul %23, %36, %cst_24 {dimension_numbers = #tpu.dot_dimension_numbers<[1], [1], [0], [0], [0, 0, 1, 0], [], []>} : vector<16x128xf32>, vector<128x128xf32>, vector<16x128xf32> -> vector<16x128xf32>
      %38 = vector.broadcast %14 : f32 to vector<16x128xf32>
      %39 = arith.mulf %38, %37 : vector<16x128xf32>
      %c0_25 = arith.constant 0 : index
      %c0_26 = arith.constant 0 : index
      %40 = vector.load %arg8[%c0_25, %c0_26] : memref<16x128xf32, #tpu.memory_space<vmem>>, vector<16x128xf32>
      tpu.vector_store %arg8[%c0_25, %c0_26], %39 {strides = array<i32>} : memref<16x128xf32, #tpu.memory_space<vmem>>, vector<16x128xf32>,
    } else {
    }
    return
  }
  func.func @transform_0(%arg0: i32, %arg1: i32) -> (i32, i32) {
    %c0_i32 = arith.constant 0 : i32
    %c0_i32_0 = arith.constant 0 : i32
    %c0_i32_1 = arith.constant 0 : i32
    return %c0_i32, %c0_i32_0 : i32, i32
  }
  func.func @transform_1(%arg0: i32, %arg1: i32) -> (i32, i32) {
    %c0_i32 = arith.constant 0 : i32
    %c0_i32_0 = arith.constant 0 : i32
    %c0_i32_1 = arith.constant 0 : i32
    return %c0_i32, %c0_i32_0 : i32, i32
  }
  func.func @transform_2(%arg0: i32, %arg1: i32) -> (i32, i32) {
    %c0_i32 = arith.constant 0 : i32
    return %arg0, %arg1 : i32, i32
  }
  func.func @transform_3(%arg0: i32, %arg1: i32) -> (i32, i32) {
    %c0_i32 = arith.constant 0 : i32
    %c0_i32_0 = arith.constant 0 : i32
    return %arg1, %c0_i32 : i32, i32
  }
  func.func @transform_4(%arg0: i32, %arg1: i32) -> (i32, i32) {
    %c0_i32 = arith.constant 0 : i32
    %c0_i32_0 = arith.constant 0 : i32
    %c0_i32_1 = arith.constant 0 : i32
    return %c0_i32, %c0_i32_0 : i32, i32
  }
  func.func @transform_5(%arg0: i32, %arg1: i32) -> (i32, i32) {
    %c0_i32 = arith.constant 0 : i32
    %c0_i32_0 = arith.constant 0 : i32
    %c0_i32_1 = arith.constant 0 : i32
    return %c0_i32, %c0_i32_0 : i32, i32
  }
  func.func @transform_6(%arg0: i32, %arg1: i32) -> (i32, i32) {
    %c0_i32 = arith.constant 0 : i32
    %c0_i32_0 = arith.constant 0 : i32
    return %arg0, %c0_i32 : i32, i32
  }
}

</mosaic_0001>

<bundles_post_ra>
// kernel: tpu_custom_call.1
= control target key start
LH: loop header
LB: loop body
LE: loop exit
PB: predicated region body
PF: predicated region fallthrough
CT: control target
= control target key end

     0   :  { %13 = vsyncpa [#allocation6], 0  ;;  %s1711_s0 = inlined_call_operand.<no memory space> [shape: f32[1,1], index: 0, kind: input, shape index: {}]   ;;  %s1712_s1 = inlined_call_operand.<no memory space> [shape: f32[1,1], index: 1, kind: input, shape index: {}]   ;;  %s1713_s2 = inlined_call_operand.hbm [shape: bf16[16,1024], index: 2, kind: input, shape index: {}]   ;;  %s1714_s3 = inlined_call_operand.hbm [shape: bf16[1024,128], index: 3, kind: input, shape index: {}]   ;;  %s1715_s4 = inlined_call_operand.hbm [shape: f32[128,128], index: 4, kind: input, shape index: {}]   ;;  %s1716_s5 = inlined_call_operand.hbm [shape: f32[128,128], index: 5, kind: input, shape index: {}]   ;;  %s1717_s6 = inlined_call_operand.hbm [shape: f32[16,128], index: 6, kind: output, shape index: {}]  }
   0x1   :  { %14 = vsyncpa [#allocation9], 0 }
   0x2   :  { %15 = vsyncpa [#allocation12], 0 }
   0x3   :  { %16 = vsyncpa [#allocation7], 0  ;;  %s1537_s21 = smov [#allocation8]  }
   0x4   :  { %s38_s22 = sshll.u32 %s1537_s21, 4  ;;  %s39_s22 = int_to_ptr.vmem [resolvable:$true] %s38_s22 }
   0x5   :  { %s1437_s23 = scalar_lea.vmem %s39_s22, 8192  ;;  %p1442_p1 = scmp.lt.s32.totalorder %s39_s22, %s39_s22 }
   0x6   :  { %p1438_p0 = scmp.ne.s32.totalorder %s39_s22, %s1437_s23  ;;  %p1443_p2 = scmp.lt.s32.totalorder %s1437_s23, %s1437_s23 }
   0x8   :  { %p1444_p3 = por %p1443_p2, %p1442_p1 }
   0xa   :  { %p1445_p4 = pnand %p1444_p3, %p1438_p0 }
   0xc   :  { %1448 = shalt.err (!%p1445_p4)
}
   0xd   :  { %s1538_s24 = smov 64   ;;  %s1539_s25 = smov 4  }
   0xe   :  { %44 = dma.hbm_to_vmem [thread:$0]  %s1714_s3, 8192, %s39_s22, [#allocation9], %s1538_s24, %s1538_s24, %s1539_s25  }
   0xf   :  { %s1540_s28 = smov [#allocation5]  }
  0x10   :  { %s26_s29 = sshll.u32 %s1540_s28, 4  ;;  %s27_s29 = int_to_ptr.vmem [resolvable:$true] %s26_s29 }
  0x11   :  { %s1457_s30 = scalar_lea.vmem %s27_s29, 1024  ;;  %p1462_p6 = scmp.lt.s32.totalorder %s27_s29, %s27_s29 }
  0x12   :  { %p1458_p5 = scmp.ne.s32.totalorder %s27_s29, %s1457_s30  ;;  %p1463_p7 = scmp.lt.s32.totalorder %s1457_s30, %s1457_s30 }
  0x14   :  { %p1464_p8 = por %p1463_p7, %p1462_p6 }
  0x16   :  { %p1465_p9 = pnand %p1464_p8, %p1458_p5 }
  0x18   :  { %1468 = shalt.err (!%p1465_p9)
}
  0x19   :  { %s1541_s7 = smov 512   ;;  %s1542_s8 = smov 32  }
  0x1a   :  { %32 = dma.hbm_to_vmem [thread:$0]  %s1713_s2, 1024, %s27_s29, [#allocation6], %s1541_s7, %s1541_s7, %s1542_s8  }
  0x1b   :  { %s1543_s11 = smov [#allocation10]  }
  0x1c   :  { %s50_s12 = sshll.u32 %s1543_s11, 4  ;;  %s51_s12 = int_to_ptr.vmem [resolvable:$true] %s50_s12 }
  0x1d   :  { %s1477_s3 = scalar_lea.vmem %s51_s12, 2048  ;;  %p1482_p11 = scmp.lt.s32.totalorder %s51_s12, %s51_s12 }
  0x1e   :  { %p1478_p10 = scmp.ne.s32.totalorder %s51_s12, %s1477_s3  ;;  %p1483_p12 = scmp.lt.s32.totalorder %s1477_s3, %s1477_s3 }
  0x20   :  { %p1484_p13 = por %p1483_p12, %p1482_p11 }
  0x22   :  { %p1485_p0 = pnand %p1484_p13, %p1478_p10 }
  0x24   :  { %1488 = shalt.err (!%p1485_p0)
}
  0x25   :  { %s1544_s13 = smov 128   ;;  %s1545_s14 = smov 8  }
  0x26   :  { %56 = dma.hbm_to_vmem [thread:$0]  %s1715_s4, 2048, %s51_s12, [#allocation9], %s1544_s13, %s1544_s13, %s1545_s14  }
  0x27   :  { %s1546_s2 = smov [#allocation11]  }
  0x28   :  { %s62_s17 = sshll.u32 %s1546_s2, 4  ;;  %s63_s17 = int_to_ptr.vmem [resolvable:$true] %s62_s17 }
  0x29   :  { %s1497_s18 = scalar_lea.vmem %s63_s17, 2048  ;;  %p1502_p2 = scmp.lt.s32.totalorder %s63_s17, %s63_s17 }
  0x2a   :  { %p1498_p1 = scmp.ne.s32.totalorder %s63_s17, %s1497_s18  ;;  %p1503_p3 = scmp.lt.s32.totalorder %s1497_s18, %s1497_s18 }
  0x2c   :  { %p1504_p4 = por %p1503_p3, %p1502_p2 }
  0x2e   :  { %p1505_p5 = pnand %p1504_p4, %p1498_p1 }
  0x30   :  { %1508 = shalt.err (!%p1505_p5)
}
  0x31   :  { %68 = dma.hbm_to_vmem [thread:$0]  %s1716_s5, 2048, %s63_s17, [#allocation12], %s1544_s13, %s1544_s13, %s1545_s14  }
  0x32   :  { %1529 = dma.done.wait [#allocation6], 1024  }
  0x33   :  { %1530 = vsyncadd [#allocation6], 4294966272 }
  0x34   :  { %1531 = dma.done.wait [#allocation9], 10240  }
  0x35   :  { %1532 = vsyncadd [#allocation9], 4294957056 }
  0x36   :  { %1533 = dma.done.wait [#allocation12], 2048  }
  0x37   :  { %1534 = vsyncadd [#allocation12], 4294965248  ;;  %v1327_v0 = vld [vmem:[#allocation8 + $0x78] sm:$0xff]   ;;  %v1329_v2 = vld [vmem:[#allocation8 + $0x70] sm:$0xff]  }
  0x38   :  { %v1328_v1 = vld [vmem:[#allocation8 + $0x38] sm:$0xff]   ;;  %1173 = vmatprep.subr.bf16.mxu1 %v1327_v0  ;;  %v1330_v3 = vld [vmem:[#allocation8 + $0x30] sm:$0xff]   ;;  %v1331_v4 = vld [vmem:[#allocation8 + $0x68] sm:$0xff]  }
  0x39   :  { %1174 = vmatpush3.bf16.msra.mxu1 %v1328_v1  ;;  %v1332_v5 = vld [vmem:[#allocation8 + $0x28] sm:$0xff]   ;;  %v1333_v6 = vld [vmem:[#allocation8 + $0x60] sm:$0xff]   ;;  %v1335_v8 = vld [vmem:[#allocation8 + $0x58] sm:$0xff]  }
  0x3a   :  { %1175 = vmatprep.subr.bf16.mxu1 %v1329_v2  ;;  %v1334_v7 = vld [vmem:[#allocation8 + $0x20] sm:$0xff]   ;;  %v1336_v9 = vld [vmem:[#allocation8 + $0x18] sm:$0xff]   ;;  %v1337_v10 = vld [vmem:[#allocation8 + $0x50] sm:$0xff]  }
  0x3b   :  { %v90_v11 = vld [vmem:[#allocation5] sm:$0xff]  ;;  %v1338_v13 = vld [vmem:[#allocation8 + $0x10] sm:$0xff]   ;;  %v1339_v15 = vld [vmem:[#allocation8 + $0x48] sm:$0xff]  }
  0x3c   :  { %v94_v12 = vld [vmem:[#allocation5 + $0x20] sm:$0xff]  ;;  %v1345_v16 = vld [vmem:[#allocation8 + $0x178] sm:$0xff]   ;;  %v1340_v18 = vld [vmem:[#allocation8 + $0x8] sm:$0xff]  }
  0x3d   :  { %1176 = vmatpush3.bf16.msra.mxu1 %v1330_v3  ;;  %v1102_v14 = vcombine.high %v90_v11, %v94_v12  ;;  %v1346_v17 = vld [vmem:[#allocation8 + $0x138] sm:$0xff]   ;;  %1217 = vmatprep.subr.bf16.mxu0 %v1345_v16  ;;  %v1341_v19 = vld [vmem:[#allocation8 + $0x40] sm:$0xff]   ;;  %v1349_v20 = vld [vmem:[#allocation8 + $0x170] sm:$0xff]   ;;  %v1101_v27 = vcombine.low %v90_v11, %v94_v12 }
  0x3e   :  { %1177 = vmatprep.subr.bf16.mxu1 %v1331_v4  ;;  %1218 = vmatpush3.bf16.msra.mxu0 %v1346_v17  ;;  %v1350_v21 = vld [vmem:[#allocation8 + $0x130] sm:$0xff]   ;;  %v1342_v22 = vld [vmem:[#allocation8] sm:$0xff]   ;;  %v1343_v23 = vld [vmem:[#allocation8 + $0xf8] sm:$0xff]   ;;  %v1604_v17 = vstv %s1711_s0 }
  0x3f   :  { %682 = vmatprep.mubr.bf16.mxu1 %v1102_v14  ;;  %1219 = vmatprep.subr.bf16.mxu0 %v1349_v20  ;;  %v1353_v24 = vld [vmem:[#allocation8 + $0x168] sm:$0xff]   ;;  %v1344_v26 = vld [vmem:[#allocation8 + $0xb8] sm:$0xff]   ;;  %v1347_v28 = vld [vmem:[#allocation8 + $0xf0] sm:$0xff]  }
  0x40   :  { %v1354_v25 = vld [vmem:[#allocation8 + $0x128] sm:$0xff]   ;;  %v1357_v29 = vld [vmem:[#allocation8 + $0x160] sm:$0xff]   ;;  %v1348_v31 = vld [vmem:[#allocation8 + $0xb0] sm:$0xff]  }
  0x41   :  { %1178 = vmatpush3.bf16.msra.mxu1 %v1332_v5  ;;  %v1358_v30 = vld [vmem:[#allocation8 + $0x120] sm:$0xff]   ;;  %v1351_v32 = vld [vmem:[#allocation8 + $0xe8] sm:$0xff]   ;;  %v1361_v33 = vld [vmem:[#allocation8 + $0x158] sm:$0xff]  }
  0x42   :  { %1179 = vmatprep.subr.bf16.mxu1 %v1333_v6  ;;  %1220 = vmatpush3.bf16.msra.mxu0 %v1350_v21  ;;  %v1362_v34 = vld [vmem:[#allocation8 + $0x118] sm:$0xff]   ;;  %v1352_v35 = vld [vmem:[#allocation8 + $0xa8] sm:$0xff]   ;;  %v1355_v36 = vld [vmem:[#allocation8 + $0xe0] sm:$0xff]  }
  0x43   :  { %1221 = vmatprep.subr.bf16.mxu0 %v1353_v24  ;;  %v1365_v37 = vld [vmem:[#allocation8 + $0x150] sm:$0xff]   ;;  %v1356_v39 = vld [vmem:[#allocation8 + $0xa0] sm:$0xff]   ;;  %v1359_v40 = vld [vmem:[#allocation8 + $0xd8] sm:$0xff]  }
  0x44   :  { %v1366_v38 = vld [vmem:[#allocation8 + $0x110] sm:$0xff]   ;;  %v1369_v41 = vld [vmem:[#allocation8 + $0x148] sm:$0xff]   ;;  %v1360_v43 = vld [vmem:[#allocation8 + $0x98] sm:$0xff]  }
  0x45   :  { %1180 = vmatpush3.bf16.msra.mxu1 %v1334_v7  ;;  %v1370_v42 = vld [vmem:[#allocation8 + $0x108] sm:$0xff]   ;;  %v1363_v44 = vld [vmem:[#allocation8 + $0xd0] sm:$0xff]   ;;  %v1373_v45 = vld [vmem:[#allocation8 + $0x140] sm:$0xff]  }
  0x46   :  { %1181 = vmatprep.subr.bf16.mxu1 %v1335_v8  ;;  %1222 = vmatpush3.bf16.msra.mxu0 %v1354_v25  ;;  %v91_v46 = vld [vmem:[#allocation5 + $0x8] sm:$0xff]  ;;  %v1374_v49 = vld [vmem:[#allocation8 + $0x100] sm:$0xff]   ;;  %v92_v50 = vld [vmem:[#allocation5 + $0x10] sm:$0xff] }
  0x47   :  { %1223 = vmatprep.subr.bf16.mxu0 %v1357_v29  ;;  %v95_v47 = vld [vmem:[#allocation5 + $0x28] sm:$0xff]  ;;  %v96_v51 = vld [vmem:[#allocation5 + $0x30] sm:$0xff]  ;;  %v1371_v57 = vld [vmem:[#allocation8 + $0xc0] sm:$0xff]  }
  0x48   :  { %v1104_v48 = vcombine.high %v91_v46, %v95_v47  ;;  %v1364_v52 = vld [vmem:[#allocation8 + $0x90] sm:$0xff]   ;;  %v1105_v53 = vcombine.low %v92_v50, %v96_v51  ;;  %v1106_v54 = vcombine.high %v92_v50, %v96_v51  ;;  %v1367_v55 = vld [vmem:[#allocation8 + $0xc8] sm:$0xff]   ;;  %v1372_v58 = vld [vmem:[#allocation8 + $0x80] sm:$0xff]   ;;  %v1103_v60 = vcombine.low %v91_v46, %v95_v47 }
  0x49   :  { %1182 = vmatpush3.bf16.msra.mxu1 %v1336_v9  ;;  %v1368_v56 = vld [vmem:[#allocation8 + $0x88] sm:$0xff]   ;;  %v1375_v59 = vld [vmem:[#allocation8 + $0x1f8] sm:$0xff]   ;;  %v1377_v62 = vld [vmem:[#allocation8 + $0x1f0] sm:$0xff]  }
  0x4a   :  { %1183 = vmatprep.subr.bf16.mxu1 %v1337_v10  ;;  %1224 = vmatpush3.bf16.msra.mxu0 %v1358_v30  ;;  %v1376_v61 = vld [vmem:[#allocation8 + $0x1b8] sm:$0xff]   ;;  %v1378_v1 = vld [vmem:[#allocation8 + $0x1b0] sm:$0xff]   ;;  %v1379_v3 = vld [vmem:[#allocation8 + $0x1e8] sm:$0xff]  }
  0x4b   :  { %1225 = vmatprep.subr.bf16.mxu0 %v1361_v33  ;;  %764 = vmatprep.mubr.bf16.mxu0 %v1106_v54  ;;  %v93_v63 = vld [vmem:[#allocation5 + $0x18] sm:$0xff]  ;;  %v1380_v4 = vld [vmem:[#allocation8 + $0x1a8] sm:$0xff]   ;;  %v1381_v5 = vld [vmem:[#allocation8 + $0x1e0] sm:$0xff]  }
  0x4c   :  { %v97_v0 = vld [vmem:[#allocation5 + $0x38] sm:$0xff]  ;;  %v1382_v6 = vld [vmem:[#allocation8 + $0x1a0] sm:$0xff]   ;;  %v1385_v9 = vld [vmem:[#allocation8 + $0x1d0] sm:$0xff]  }
  0x4d   :  { %1184 = vmatpush3.bf16.msra.mxu1 %v1338_v13  ;;  %v1108_v2 = vcombine.high %v93_v63, %v97_v0  ;;  %v1383_v7 = vld [vmem:[#allocation8 + $0x1d8] sm:$0xff]   ;;  %v1386_v10 = vld [vmem:[#allocation8 + $0x190] sm:$0xff]   ;;  %v1387_v11 = vld [vmem:[#allocation8 + $0x1c8] sm:$0xff]  }
  0x4e   :  { %1185 = vmatprep.subr.bf16.mxu1 %v1339_v15  ;;  %1226 = vmatpush3.bf16.msra.mxu0 %v1362_v34  ;;  %v1384_v8 = vld [vmem:[#allocation8 + $0x198] sm:$0xff]   ;;  %v1388_v12 = vld [vmem:[#allocation8 + $0x188] sm:$0xff]   ;;  %v1389_v13 = vld [vmem:[#allocation8 + $0x1c0] sm:$0xff]   ;;  %v1107_v15 = vcombine.low %v93_v63, %v97_v0 }
  0x4f   :  { %1227 = vmatprep.subr.bf16.mxu0 %v1365_v37  ;;  %v1390_v14 = vld [vmem:[#allocation8 + $0x180] sm:$0xff]   ;;  %v872_v16 = vld [vmem:[#allocation11 + $0x78] sm:$0xff]  ;;  %v855_v20 = vld [vmem:[#allocation10 + $0x70] sm:$0xff] }
  0x50   :  { %v871_v21 = vld [vmem:[#allocation11 + $0x70] sm:$0xff]  ;;  %v854_v24 = vld [vmem:[#allocation10 + $0x68] sm:$0xff]  ;;  %v852_v29 = vld [vmem:[#allocation10 + $0x58] sm:$0xff] }
  0x51   :  { %1186 = vmatpush3.bf16.msra.mxu1 %v1340_v18  ;;  %v889_v18 = vmul.f32 %v1604_v17, %v872_v16  ;;  %v870_v25 = vld [vmem:[#allocation11 + $0x68] sm:$0xff]  ;;  %v868_v30 = vld [vmem:[#allocation11 + $0x58] sm:$0xff]  ;;  %v865_v51 = vld [vmem:[#allocation11 + $0x40] sm:$0xff] }
  0x52   :  { %1187 = vmatprep.subr.bf16.mxu1 %v1341_v19  ;;  %1228 = vmatpush3.bf16.msra.mxu0 %v1366_v38  ;;  %v856_v19 = vld [vmem:[#allocation10 + $0x78] sm:$0xff]  ;;  %v885_v34 = vmul.f32 %v1604_v17, %v868_v30  ;;  %v866_v47 = vld [vmem:[#allocation11 + $0x48] sm:$0xff]  ;;  %v849_v54 = vld [vmem:[#allocation10 + $0x40] sm:$0xff] }
  0x53   :  { %1229 = vmatprep.subr.bf16.mxu0 %v1369_v41  ;;  %v851_v41 = vld [vmem:[#allocation10 + $0x50] sm:$0xff] }
  0x54   :  { %v847_v0 = vld [vmem:[#allocation10 + $0x30] sm:$0xff] }
  0x55   :  { %1188 = vmatpush3.bf16.msra.mxu1 %v1342_v22  ;;  %v1607_v22 = vadd.f32 %v889_v18, %v856_v19 }
  0x56   :  { %1195 = vmatprep.subr.bf16.mxu1 %v1343_v23  ;;  %1230 = vmatpush3.bf16.msra.mxu0 %v1370_v42  ;;  %v888_v23 = vmul.f32 %v1604_v17, %v871_v21 }
  0x57   :  { %1231 = vmatprep.subr.bf16.mxu0 %v1373_v45 }
  0x58   :  { %683 = vmatmul.mubr.bf16.vlgmr.msra.gmra.mxu1 %v1101_v27  ;;  %v887_v27 = vmul.f32 %v1604_v17, %v870_v25  ;;  %v858_v25 = vld [vmem:[#allocation11 + $0x8] sm:$0xff] }
  0x59   :  { %1196 = vmatpush3.bf16.msra.mxu1 %v1344_v26  ;;  %723 = vmatprep.mubr.bf16.mxu1 %v1104_v48  ;;  %v853_v26 = vld [vmem:[#allocation10 + $0x60] sm:$0xff]  ;;  %v883_v48 = vmul.f32 %v1604_v17, %v866_v47 }
  0x5a   :  { %1197 = vmatprep.subr.bf16.mxu1 %v1347_v28  ;;  %1232 = vmatpush3.bf16.msra.mxu0 %v1374_v49  ;;  %v869_v28 = vld [vmem:[#allocation11 + $0x60] sm:$0xff]  ;;  %v850_v49 = vld [vmem:[#allocation10 + $0x48] sm:$0xff] }
  0x5b   :  { %v886_v33 = vmul.f32 %v1604_v17, %v869_v28  ;;  %v1637_v50 = vadd.f32 %v883_v48, %v850_v49 }
  0x5d   :  { %1198 = vmatpush3.bf16.msra.mxu1 %v1348_v31  ;;  %765 = vmatmul.mubr.bf16.vlgmr.msra.gmra.mxu0 %v1105_v53  ;;  %v921_v31 = vmul.f32 %v1607_v22, %v1607_v22  ;;  %v882_v53 = vmul.f32 %v1604_v17, %v865_v51 }
  0x5e   :  { %1199 = vmatprep.subr.bf16.mxu1 %v1351_v32  ;;  %v1613_v32 = vadd.f32 %v888_v23, %v855_v20 }
  0x5f   :  { %952 = vadd.xlane.f32.xlu0 %v921_v31 }
  0x60   :  { %v920_v38 = vmul.f32 %v1613_v32, %v1613_v32 }
  0x61   :  { %1200 = vmatpush3.bf16.msra.mxu1 %v1352_v35  ;;  %v867_v35 = vld [vmem:[#allocation11 + $0x50] sm:$0xff] }
  0x62   :  { %1201 = vmatprep.subr.bf16.mxu1 %v1355_v36  ;;  %v1617_v36 = vadd.f32 %v887_v27, %v854_v24  ;;  %v884_v37 = vmul.f32 %v1604_v17, %v867_v35  ;;  %v842_v27 = vld [vmem:[#allocation10 + $0x8] sm:$0xff] }
  0x63   :  { %950 = vadd.xlane.f32.xlu0 %v920_v38 }
  0x64   :  { %v919_v42 = vmul.f32 %v1617_v36, %v1617_v36 }
  0x65   :  { %1202 = vmatpush3.bf16.msra.mxu1 %v1356_v39  ;;  %v1622_v39 = vadd.f32 %v886_v33, %v853_v26  ;;  %v875_v26 = vmul.f32 %v1604_v17, %v858_v25  ;;  %v841_v33 = vld [vmem:[#allocation10] sm:$0xff] }
  0x66   :  { %1203 = vmatprep.subr.bf16.mxu1 %v1359_v40  ;;  %v1624_v40 = vadd.f32 %v885_v34, %v852_v29  ;;  %948 = vadd.xlane.f32.xlu1 %v919_v42  ;;  %v857_v29 = vld [vmem:[#allocation11] sm:$0xff] }
  0x67   :  { %v1677_v28 = vadd.f32 %v875_v26, %v842_v27  ;;  %v874_v31 = vmul.f32 %v1604_v17, %v857_v29 }
  0x68   :  { %v917_v45 = vmul.f32 %v1624_v40, %v1624_v40 }
  0x69   :  { %1204 = vmatpush3.bf16.msra.mxu1 %v1360_v43  ;;  %v918_v43 = vmul.f32 %v1622_v39, %v1622_v39  ;;  %v907_v30 = vmul.f32 %v1677_v28, %v1677_v28  ;;  %v1682_v34 = vadd.f32 %v874_v31, %v841_v33 }
  0x6a   :  { %1205 = vmatprep.subr.bf16.mxu1 %v1363_v44  ;;  %v1630_v44 = vadd.f32 %v884_v37, %v851_v41  ;;  %944 = vadd.xlane.f32.xlu0 %v917_v45 }
  0x6b   :  { %946 = vadd.xlane.f32.xlu1 %v918_v43  ;;  %v906_v35 = vmul.f32 %v1682_v34, %v1682_v34 }
  0x6c   :  { %v916_v46 = vmul.f32 %v1630_v44, %v1630_v44 }
  0x6d   :  { %1206 = vmatpush3.bf16.msra.mxu1 %v1364_v52  ;;  %v915_v52 = vmul.f32 %v1637_v50, %v1637_v50 }
  0x6e   :  { %1207 = vmatprep.subr.bf16.mxu1 %v1367_v55  ;;  %v1642_v55 = vadd.f32 %v882_v53, %v849_v54 }
  0x6f   :  { %942 = vadd.xlane.f32.xlu1 %v916_v46  ;;  %940 = vadd.xlane.f32.xlu0 %v915_v52 }
  0x71   :  { %1208 = vmatpush3.bf16.msra.mxu1 %v1368_v56  ;;  %v864_v56 = vld [vmem:[#allocation11 + $0x38] sm:$0xff] }
  0x72   :  { %1209 = vmatprep.subr.bf16.mxu1 %v1371_v57  ;;  %v914_v57 = vmul.f32 %v1642_v55, %v1642_v55 }
  0x74   :  { %938 = vadd.xlane.f32.xlu1 %v914_v57 }
  0x75   :  { %1210 = vmatpush3.bf16.msra.mxu1 %v1372_v58  ;;  %v881_v58 = vmul.f32 %v1604_v17, %v864_v56 }
  0x76   :  { %1239 = vmatprep.subr.bf16.mxu1 %v1375_v59  ;;  %v848_v59 = vld [vmem:[#allocation10 + $0x38] sm:$0xff] }
  0x78   :  { %724 = vmatmul.mubr.bf16.vlgmr.msra.gmra.mxu1 %v1103_v60  ;;  %v1647_v60 = vadd.f32 %v881_v58, %v848_v59 }
  0x79   :  { %1240 = vmatpush3.bf16.msra.mxu1 %v1376_v61  ;;  %805 = vmatprep.mubr.bf16.mxu1 %v1108_v2  ;;  %v863_v61 = vld [vmem:[#allocation11 + $0x30] sm:$0xff]  ;;  %v862_v2 = vld [vmem:[#allocation11 + $0x28] sm:$0xff] }
  0x7a   :  { %1241 = vmatprep.subr.bf16.mxu1 %v1377_v62  ;;  %v913_v62 = vmul.f32 %v1647_v60, %v1647_v60  ;;  %v880_v63 = vmul.f32 %v1604_v17, %v863_v61 }
  0x7c   :  { %936 = vadd.xlane.f32.xlu0 %v913_v62 }
  0x7d   :  { %1242 = vmatpush3.bf16.msra.mxu1 %v1378_v1  ;;  %v846_v1 = vld [vmem:[#allocation10 + $0x28] sm:$0xff] }
  0x7e   :  { %1243 = vmatprep.subr.bf16.mxu1 %v1379_v3  ;;  %v1652_v3 = vadd.f32 %v880_v63, %v847_v0 }
  0x81   :  { %1244 = vmatpush3.bf16.msra.mxu1 %v1380_v4  ;;  %v879_v4 = vmul.f32 %v1604_v17, %v862_v2 }
  0x82   :  { %1245 = vmatprep.subr.bf16.mxu1 %v1381_v5  ;;  %v845_v5 = vld [vmem:[#allocation10 + $0x20] sm:$0xff] }
  0x85   :  { %1246 = vmatpush3.bf16.msra.mxu1 %v1382_v6  ;;  %v861_v6 = vld [vmem:[#allocation11 + $0x20] sm:$0xff] }
  0x86   :  { %1247 = vmatprep.subr.bf16.mxu1 %v1383_v7  ;;  %v844_v7 = vld [vmem:[#allocation10 + $0x18] sm:$0xff] }
  0x89   :  { %1248 = vmatpush3.bf16.msra.mxu1 %v1384_v8  ;;  %v878_v8 = vmul.f32 %v1604_v17, %v861_v6 }
  0x8a   :  { %1249 = vmatprep.subr.bf16.mxu1 %v1385_v9  ;;  %v860_v9 = vld [vmem:[#allocation11 + $0x18] sm:$0xff] }
  0x8b   :  { %v1662_v16 = vadd.f32 %v878_v8, %v845_v5 }
  0x8d   :  { %1250 = vmatpush3.bf16.msra.mxu1 %v1386_v10  ;;  %v843_v10 = vld [vmem:[#allocation10 + $0x10] sm:$0xff]  ;;  %v910_v21 = vmul.f32 %v1662_v16, %v1662_v16 }
  0x8e   :  { %1251 = vmatprep.subr.bf16.mxu1 %v1387_v11  ;;  %v859_v11 = vld [vmem:[#allocation11 + $0x10] sm:$0xff] }
  0x91   :  { %1252 = vmatpush3.bf16.msra.mxu1 %v1388_v12  ;;  %v912_v12 = vmul.f32 %v1652_v3, %v1652_v3 }
  0x92   :  { %1253 = vmatprep.subr.bf16.mxu1 %v1389_v13  ;;  %v1658_v13 = vadd.f32 %v879_v4, %v846_v1 }
  0x93   :  { %934 = vadd.xlane.f32.xlu1 %v912_v12 }
  0x94   :  { %v911_v18 = vmul.f32 %v1658_v13, %v1658_v13 }
  0x95   :  { %1254 = vmatpush3.bf16.msra.mxu1 %v1390_v14  ;;  %v877_v14 = vmul.f32 %v1604_v17, %v860_v9 }
  0x96   :  { %932 = vadd.xlane.f32.xlu0 %v911_v18 }
  0x97   :  { %v1666_v19 = vadd.f32 %v877_v14, %v844_v7  ;;  %930 = vadd.xlane.f32.xlu1 %v910_v21 }
  0x98   :  { %806 = vmatmul.mubr.bf16.vlgmr.msra.gmra.mxu1 %v1107_v15  ;;  %v876_v15 = vmul.f32 %v1604_v17, %v859_v11 }
  0x99   :  { %v909_v23 = vmul.f32 %v1666_v19, %v1666_v19 }
  0x9a   :  { %v1668_v20 = vadd.f32 %v876_v15, %v843_v10 }
  0x9b   :  { %928 = vadd.xlane.f32.xlu0 %v909_v23 }
  0x9c   :  { %v908_v24 = vmul.f32 %v1668_v20, %v1668_v20 }
  0x9e   :  { %926 = vadd.xlane.f32.xlu1 %v908_v24 }
  0x9f   :  { %924 = vadd.xlane.f32.xlu0 %v907_v30 }
  0xa2   :  { %922 = vadd.xlane.f32.xlu1 %v906_v35 }
  0xe8   :  { %v953_v37 = vpop.xlane.xlu0 %952 }
  0xe9   :  { %v969_v38 = vmax.f32 %v953_v37, 1e-30 }
  0xeb   :  { %1391 = vrsqrt.f32 %v969_v38 }
  0xec   :  { %v951_v42 = vpop.xlane.xlu0 %950 }
  0xed   :  { %v968_v45 = vmax.f32 %v951_v42, 1e-30 }
  0xef   :  { %v949_v41 = vpop.xlane.xlu1 %948 }
  0xf0   :  { %v967_v43 = vmax.f32 %v949_v41, 1e-30 }
  0xf2   :  { %1393 = vrsqrt.f32 %v967_v43 }
  0xf3   :  { %1395 = vrsqrt.f32 %v968_v45  ;;  %v945_v17 = vpop.xlane.xlu0 %944 }
  0xf4   :  { %v947_v46 = vpop.xlane.xlu1 %946  ;;  %v965_v48 = vmax.f32 %v945_v17, 1e-30 }
  0xf5   :  { %v966_v47 = vmax.f32 %v947_v46, 1e-30 }
  0xf7   :  { %1397 = vrsqrt.f32 %v966_v47 }
  0xf8   :  { %v943_v49 = vpop.xlane.xlu1 %942  ;;  %1399 = vrsqrt.f32 %v965_v48  ;;  %v1392_v53 = vpop.eup %1391 }
  0xf9   :  { %v964_v52 = vmax.f32 %v943_v49, 1e-30  ;;  %v1001_v56 = vmul.f32 %v1392_v53, %v1607_v22  ;;  %v941_v0 = vpop.xlane.xlu0 %940 }
  0xfa   :  { %v963_v2 = vmax.f32 %v941_v0, 1e-30 }
  0xfb   :  { %1401 = vrsqrt.f32 %v964_v52  ;;  %1279 = vmatprep.subr.mxu0 %v1001_v56 }
  0xfc   :  { %1280 = vmatpush3.xpose.msra.mxu0 %v1001_v56  ;;  %1403 = vrsqrt.f32 %v963_v2 }
  0xfd   :  { %v939_v6 = vpop.xlane.xlu1 %938 }
  0xfe   :  { %v962_v7 = vmax.f32 %v939_v6, 1e-30 }
  0xff   :  { %v1394_v57 = vpop.eup %1393 }
 0x100   :  { %v1396_v58 = vpop.eup %1395  ;;  %v999_v62 = vmul.f32 %v1394_v57, %v1617_v36  ;;  %1405 = vrsqrt.f32 %v962_v7 }
 0x101   :  { %v1000_v61 = vmul.f32 %v1396_v58, %v1613_v32 }
 0x103   :  { %1281 = vmatprep.subr.mxu0 %v1000_v61 }
 0x104   :  { %v1398_v63 = vpop.eup %1397  ;;  %1282 = vmatpush3.xpose.msra.mxu0 %v1000_v61 }
 0x105   :  { %1283 = vmatprep.subr.mxu0 %v999_v62  ;;  %v998_v4 = vmul.f32 %v1398_v63, %v1622_v39  ;;  %v1400_v22 = vpop.eup %1399  ;;  %v937_v10 = vpop.xlane.xlu0 %936 }
 0x106   :  { %v997_v32 = vmul.f32 %v1400_v22, %v1624_v40  ;;  %v961_v11 = vmax.f32 %v937_v10, 1e-30 }
 0x108   :  { %1284 = vmatpush3.xpose.msra.mxu0 %v999_v62  ;;  %v1402_v8 = vpop.eup %1401  ;;  %1407 = vrsqrt.f32 %v961_v11 }
 0x109   :  { %1285 = vmatprep.subr.mxu0 %v998_v4  ;;  %v996_v12 = vmul.f32 %v1402_v8, %v1630_v44  ;;  %v1404_v26 = vpop.eup %1403 }
 0x10a   :  { %v995_v44 = vmul.f32 %v1404_v26, %v1637_v50 }
 0x10c   :  { %1286 = vmatpush3.xpose.msra.mxu0 %v998_v4 }
 0x10d   :  { %1287 = vmatprep.subr.mxu0 %v997_v32  ;;  %v1406_v42 = vpop.eup %1405 }
 0x10e   :  { %v994_v46 = vmul.f32 %v1406_v42, %v1642_v55 }
 0x110   :  { %1288 = vmatpush3.xpose.msra.mxu0 %v997_v32 }
 0x111   :  { %1289 = vmatprep.subr.mxu0 %v996_v12 }
 0x114   :  { %1290 = vmatpush3.xpose.msra.mxu0 %v996_v12 }
 0x115   :  { %1291 = vmatprep.subr.mxu0 %v995_v44  ;;  %v1408_v53 = vpop.eup %1407 }
 0x116   :  { %v993_v58 = vmul.f32 %v1408_v53, %v1647_v60 }
 0x118   :  { %v1189_v51 = vpop.f32.mrf.mxu1  ;;  %1292 = vmatpush3.xpose.msra.mxu0 %v995_v44 }
 0x119   :  { %1293 = vmatprep.subr.mxu0 %v994_v46 }
 0x11a   :  { %v1190_v54 = vpop.f32.mrf.mxu1 }
 0x11b   :  { %v1191_v27 = vadd.f32 %v1190_v54, %v1189_v51 }
 0x11c   :  { %v1192_v59 = vpop.f32.mrf.mxu1  ;;  %v935_v15 = vpop.xlane.xlu1 %934  ;;  %1294 = vmatpush3.xpose.msra.mxu0 %v994_v46 }
 0x11d   :  { %v1233_v9 = vpop.f32.mrf.mxu0  ;;  %v960_v18 = vmax.f32 %v935_v15, 1e-30  ;;  %1295 = vmatprep.subr.mxu0 %v993_v58 }
 0x11e   :  { %v1193_v1 = vpop.f32.mrf.mxu1 }
 0x11f   :  { %v1234_v14 = vpop.f32.mrf.mxu0  ;;  %v933_v23 = vpop.xlane.xlu0 %932  ;;  %1409 = vrsqrt.f32 %v960_v18  ;;  %v1194_v43 = vadd.f32 %v1193_v1, %v1192_v59 }
 0x120   :  { %v959_v25 = vmax.f32 %v933_v23, 1e-30  ;;  %v931_v29 = vpop.xlane.xlu1 %930  ;;  %v1235_v33 = vadd.f32 %v1234_v14, %v1233_v9  ;;  %1296 = vmatpush3.xpose.msra.mxu0 %v993_v58 }
 0x121   :  { %v1236_v24 = vpop.f32.mrf.mxu0  ;;  %v958_v30 = vmax.f32 %v931_v29, 1e-30 }
 0x122   :  { %1411 = vrsqrt.f32 %v959_v25 }
 0x123   :  { %v1237_v38 = vpop.f32.mrf.mxu0  ;;  %1413 = vrsqrt.f32 %v958_v30 }
 0x124   :  { %v929_v37 = vpop.xlane.xlu0 %928  ;;  %v1238_v50 = vadd.f32 %v1237_v38, %v1236_v24 }
 0x125   :  { %v957_v47 = vmax.f32 %v929_v37, 1e-30 }
 0x127   :  { %v927_v17 = vpop.xlane.xlu1 %926  ;;  %1415 = vrsqrt.f32 %v957_v47 }
 0x128   :  { %v956_v56 = vmax.f32 %v927_v17, 1e-30  ;;  %v925_v22 = vpop.xlane.xlu0 %924 }
 0x129   :  { %v955_v60 = vmax.f32 %v925_v22, 1e-30 }
 0x12a   :  { %1417 = vrsqrt.f32 %v956_v56 }
 0x12b   :  { %1419 = vrsqrt.f32 %v955_v60  ;;  %v923_v6 = vpop.xlane.xlu1 %922 }
 0x12c   :  { %v1410_v55 = vpop.eup %1409  ;;  %v954_v7 = vmax.f32 %v923_v6, 1e-30 }
 0x12d   :  { %v992_v0 = vmul.f32 %v1410_v55, %v1652_v3 }
 0x12e   :  { %1421 = vrsqrt.f32 %v954_v7 }
 0x12f   :  { %v1412_v1 = vpop.eup %1411  ;;  %1297 = vmatprep.subr.mxu0 %v992_v0 }
 0x130   :  { %v991_v4 = vmul.f32 %v1412_v1, %v1658_v13  ;;  %1298 = vmatpush3.xpose.msra.mxu0 %v992_v0 }
 0x132   :  { %1299 = vmatprep.subr.mxu0 %v991_v4 }
 0x134   :  { %1300 = vmatpush3.xpose.msra.mxu0 %v991_v4 }
 0x138   :  { %v1211_v5 = vpop.f32.mrf.mxu1 }
 0x13a   :  { %v1212_v36 = vpop.f32.mrf.mxu1 }
 0x13b   :  { %v1213_v21 = vadd.f32 %v1212_v36, %v1211_v5  ;;  %v1414_v5 = vpop.eup %1413 }
 0x13c   :  { %v1214_v39 = vpop.f32.mrf.mxu1  ;;  %v990_v32 = vmul.f32 %v1414_v5, %v1662_v16  ;;  %v1416_v8 = vpop.eup %1415 }
 0x13d   :  { %v726_v31 = vadd.f32 %v1213_v21, %v1191_v27  ;;  %v1418_v3 = vpop.eup %1417  ;;  %v989_v36 = vmul.f32 %v1416_v8, %v1666_v19  ;;  %v823_v19 = vstv %s1712_s1  ;;  %s1547_s1 = smov [#allocation13]  }
 0x13e   :  { %v1215_v40 = vpop.f32.mrf.mxu1  ;;  %1301 = vmatprep.subr.mxu0 %v990_v32  ;;  %v988_v13 = vmul.f32 %v1418_v3, %v1668_v20  ;;  %v1420_v9 = vpop.eup %1419  ;;  %v824_v12 = vmul.f32 1.442695, %v823_v19  ;;  %s1087_s23 = sshll.u32 %s1547_s1, 4  ;;  %s1088_s23 = int_to_ptr.vmem [resolvable:$true] %s1087_s23 }
 0x13f   :  { %v1216_v35 = vadd.f32 %v1215_v40, %v1214_v39  ;;  %v767_v48 = vadd.f32 %v1235_v33, %v726_v31  ;;  %1302 = vmatpush3.xpose.msra.mxu0 %v990_v32  ;;  %v987_v10 = vmul.f32 %v1420_v9, %v1677_v28  ;;  %v1422_v11 = vpop.eup %1421  ;;  %s1509_s24 = scalar_lea.vmem %s1088_s23, 256  ;;  %p1514_p7 = scmp.lt.s32.totalorder %s1088_s23, %s1088_s23 }
 0x140   :  { %1303 = vmatprep.subr.mxu0 %v989_v36  ;;  %v986_v16 = vmul.f32 %v1422_v11, %v1682_v34  ;;  %1423 = vpow2.f32 %v824_v12  ;;  %p1510_p6 = scmp.ne.s32.totalorder %s1088_s23, %s1509_s24  ;;  %p1515_p8 = scmp.lt.s32.totalorder %s1509_s24, %s1509_s24 }
 0x141   :  { %v729_v49 = vadd.f32 %v1216_v35, %v1194_v43 }
 0x142   :  { %p1516_p9 = por %p1515_p8, %p1514_p7 }
 0x143   :  { %v770_v59 = vadd.f32 %v1238_v50, %v729_v49  ;;  %1304 = vmatpush3.xpose.msra.mxu0 %v989_v36 }
 0x144   :  { %1305 = vmatprep.subr.mxu0 %v988_v13  ;;  %p1517_p10 = pnand %p1516_p9, %p1510_p6 }
 0x147   :  { %1306 = vmatpush3.xpose.msra.mxu0 %v988_v13 }
 0x148   :  { %1307 = vmatprep.subr.mxu0 %v987_v10 }
 0x14b   :  { %1308 = vmatpush3.xpose.msra.mxu0 %v987_v10 }
 0x14c   :  { %1309 = vmatprep.subr.mxu0 %v986_v16 }
 0x14d   :  { %v1424_v39 = vpop.eup %1423 }
 0x14e   :  { %1314 = vpush %v1424_v39 }
 0x14f   :  { %1310 = vmatpush3.xpose.msra.mxu0 %v986_v16 }
 0x158   :  { %v1255_v41 = vpop.f32.mrf.mxu1 }
 0x15a   :  { %v1256_v45 = vpop.f32.mrf.mxu1 }
 0x15b   :  { %v1257_v51 = vadd.f32 %v1256_v45, %v1255_v41 }
 0x15c   :  { %v1258_v52 = vpop.f32.mrf.mxu1 }
 0x15d   :  { %v808_v54 = vadd.f32 %v1257_v51, %v767_v48 }
 0x15e   :  { %v1259_v57 = vpop.f32.mrf.mxu1 }
 0x15f   :  { %v1260_v61 = vadd.f32 %v1259_v57, %v1258_v52  ;;  %v829_v62 = vmul.f32 %v808_v54, %v808_v54 }
 0x161   :  { %v811_v63 = vadd.f32 %v1260_v61, %v770_v59  ;;  %831 = vadd.xlane.f32.xlu0 %v829_v62 }
 0x163   :  { %v830_v2 = vmul.f32 %v811_v63, %v811_v63 }
 0x165   :  { %833 = vadd.xlane.f32.xlu1 %v830_v2 }
 0x17f   :  { %s1315_s22 = spop %1314 }
 0x180   :  { %v1077_v40 = vstv %s1315_s22 }
 0x1ea   :  { %v832_v20 = vpop.xlane.xlu0 %831 }
 0x1eb   :  { %v835_v14 = vmax.f32 %v832_v20, 1e-30 }
 0x1ed   :  { %1425 = vrsqrt.f32 %v835_v14 }
 0x1ee   :  { %v834_v15 = vpop.xlane.xlu1 %833 }
 0x1ef   :  { %v836_v28 = vmax.f32 %v834_v15, 1e-30 }
 0x1f1   :  { %1427 = vrsqrt.f32 %v836_v28 }
 0x1fa   :  { %v1426_v18 = vpop.eup %1425 }
 0x1fb   :  { %v839_v21 = vmul.f32 %v1426_v18, %v808_v54 }
 0x1fd   :  { %1311 = vmatprep.mubr.f32.mxu0 %v839_v21 }
 0x1fe   :  { %v1428_v34 = vpop.eup %1427 }
 0x1ff   :  { %v840_v23 = vmul.f32 %v1428_v34, %v811_v63 }
 0x201   :  { %1312 = vmatmul.mubr.f32.vlgmr.msra.gmra.mxu0 %v840_v23 }
 0x2c1   :  { %v1313_v24 = vpop.f32.mrf.mxu0 }
 0x2c2   :  { %v1079_v25 = vmul.f32 %v1313_v24, %v1077_v40 }
 0x2c3   :  { %v1068_v26 = vpop.f32.mrf.mxu0 }
 0x2c4   :  { %1081 = vst [vmem:[#allocation13 + $0x8] sm:$0xff] %v1079_v25  ;;  %v1078_v27 = vmul.f32 %v1077_v40, %v1068_v26 }
 0x2c6   :  { %1080 = vst [vmem:[#allocation13] sm:$0xff] %v1078_v27 }
 0x2c7   :  { %1520 = shalt.err (!%p1517_p10)
}
 0x2c8   :  { %1093 = dma.vmem_to_hbm [thread:$0]  %s1088_s23, 256, %s1717_s6, [#allocation7], %s1544_s13, %s1544_s13, %s1545_s14  }
 0x2c9   :  { %1535 = dma.done.wait [#allocation7], 256  }
 0x2ca   :  { %1536 = vsyncadd [#allocation7], 4294967040 }
 0x2cb   :  { %1097 = vsyncpa [#allocation6], 1 }
 0x2cc   :  { %1098 = vsyncpa [#allocation9], 1 }
 0x2cd   :  { %1099 = vsyncpa [#allocation12], 1 }
 0x2ce   :  { %1100 = vsyncpa [#allocation7], 1 }

</bundles_post_ra>
